<compile_context>
chip_gen: v7x
topology: tpu7x:2x2x1
jax: 0.10.0
libtpu: 0.0.40
codegen_flags: <defaults>
</compile_context>

<pallas_src>
from functools import partial

import jax
import jax.numpy as jnp
from jax.experimental import pallas as pl
from jax.experimental.pallas import tpu as pltpu

H1 = 64    # per-branch hidden 1
H2 = 32    # per-branch hidden 2
LANES = 128


def vae_kernel(xe_ref, slab_ref, out_ref, *, input_dim):
    """Fused two-branch VAE encoder + reparameterize + reconstruction.

    xe_ref   : (B, 128)  cols = [x (input_dim) | eps_beta | eps_mu | 0-pad]
    slab_ref : (R, 128)  rows = [W1_fused (input_dim) | b1 | b2(pad) | bh(pad)
                                 | block-diag W2 (128 rows, lane-pad)
                                 | fused head W (64 rows, lane-pad) | 0-pad]
    out_ref  : (B, 128)  cols = [recon (input_dim) | mu_b | mu_m | lv_b | lv_m | 0-pad]
    """
    B = xe_ref.shape[0]

    xe = xe_ref[...]                                    # (B, 128)
    x = xe[:, 0:input_dim]                              # (B, input_dim)
    eps = xe[:, input_dim:input_dim + 2]                # (B, 2) = [eps_b, eps_m]

    r = input_dim
    w1 = slab_ref[0:r, :]                               # (input_dim, 128)
    b1 = slab_ref[r:r + 1, :]                           # (1, 128)
    b2 = slab_ref[r + 1:r + 2, 0:2 * H2]                # (1, 64)
    bh = slab_ref[r + 2:r + 3, 0:4]                     # (1, 4)
    w2 = slab_ref[r + 3:r + 3 + 2 * H1, 0:2 * H2]       # (128, 64) block-diagonal
    wh = slab_ref[r + 3 + 2 * H1:r + 3 + 2 * H1 + H1, 0:4]  # (64, 4) fused heads

    # Layer 1 (both branches fused along lanes). input_dim == 1 makes the
    # matmul a degenerate K=1 outer product -> broadcast multiply on the VPU.
    if input_dim == 1:
        h1 = x * w1 + b1                                # (B,1)*(1,128) -> (B,128)
    else:
        h1 = jnp.dot(x, w1, preferred_element_type=jnp.float32) + b1
    h1 = jnp.maximum(h1, 0.0)

    # Layer 2 (block-diagonal keeps branches independent): (B,128)@(128,64).
    h2 = jnp.dot(h1, w2, preferred_element_type=jnp.float32) + b2
    h2 = jnp.maximum(h2, 0.0)                           # (B, 64)

    # All four heads in one dot: (B,64)@(64,4) -> [mu_b, mu_m, lv_b, lv_m].
    heads = jnp.dot(h2, wh, preferred_element_type=jnp.float32) + bh  # (B, 4)

    # reparameterize for both branches at once: z = mu + eps * exp(0.5*log_var)
    z = heads[:, 0:2] + eps * jnp.exp(0.5 * heads[:, 2:4])  # (B, 2) = [z_b, z_m]
    recon = z[:, 0:1] * x + z[:, 1:2]                        # (B, input_dim)

    # Single lane-dense full-tile store.
    pad = jnp.zeros((B, out_ref.shape[1] - input_dim - 4), jnp.float32)
    out_ref[...] = jnp.concatenate([recon, heads, pad], axis=1)


def _lane_pad(a):
    return jnp.pad(a, ((0, 0), (0, LANES - a.shape[1])))


def pack_params(params):
    """Pack 16 per-layer tensors into ONE lane-padded f32 slab (rows % 8 == 0)."""
    (w1b, b1b, w2b, b2b, wmub, bmub, wlvb, blvb,
     w1m, b1m, w2m, b2m, wmum, bmum, wlvm, blvm) = params
    input_dim = w1b.shape[0]

    # Layer 1: stack beta | mu along output axis -> (input_dim, 128)
    w1 = jnp.concatenate([w1b, w1m], axis=1)
    b1 = jnp.concatenate([b1b, b1m], axis=1)            # (1, 128)

    # Layer 2: block-diagonal (128, 64)
    z = jnp.zeros((H1, H2), jnp.float32)
    w2 = jnp.concatenate(
        [jnp.concatenate([w2b, z], axis=1),
         jnp.concatenate([z, w2m], axis=1)], axis=0)
    b2 = jnp.concatenate([b2b, b2m], axis=1)            # (1, 64)

    # Heads fused into (64, 4); column order = [mu_b, mu_m, lv_b, lv_m]
    zc = jnp.zeros((H2, 1), jnp.float32)
    wh = jnp.concatenate(
        [jnp.concatenate([wmub, zc, wlvb, zc], axis=1),
         jnp.concatenate([zc, wmum, zc, wlvm], axis=1)], axis=0)  # (64, 4)
    bh = jnp.concatenate([bmub, bmum, blvb, blvm], axis=1)        # (1, 4)

    slab = jnp.concatenate([
        w1,                     # rows 0 : input_dim
        b1,                     # row  input_dim
        _lane_pad(b2),          # row  input_dim + 1
        _lane_pad(bh),          # row  input_dim + 2
        _lane_pad(w2),          # rows input_dim + 3 : +128
        _lane_pad(wh),          # rows input_dim + 131 : +64
    ], axis=0)                  # (input_dim + 195, 128)

    pad_rows = (-slab.shape[0]) % 8
    if pad_rows:
        slab = jnp.pad(slab, ((0, pad_rows), (0, 0)))
    return slab


def vae_forward(x, eps_beta, eps_mu, slab):
    """Returns (recon_y, mu_beta, log_var_beta, mu_mu, log_var_mu)."""
    B, input_dim = x.shape

    # Lane-pad the data input to a full (B, 128) tile: [x | eps_b | eps_m | 0].
    xe = jnp.concatenate([x, eps_beta, eps_mu], axis=1)
    xe = jnp.pad(xe, ((0, 0), (0, LANES - xe.shape[1])))

    vmem = pl.BlockSpec(memory_space=pltpu.MemorySpace.VMEM)
    cost = pl.CostEstimate(
        flops=2 * B * (2 * H1 * 2 * H2 + 2 * H2 * 4) + 4 * B * LANES,
        transcendentals=2 * B,
        bytes_accessed=4 * (slab.size + xe.size + B * LANES),
    )

    out = pl.pallas_call(
        partial(vae_kernel, input_dim=input_dim),
        out_shape=jax.ShapeDtypeStruct((B, LANES), jnp.float32),
        in_specs=[vmem, vmem],
        out_specs=vmem,
        cost_estimate=cost,
    )(xe, slab)

    recon = out[:, 0:input_dim]
    mu_b = out[:, input_dim:input_dim + 1]
    mu_m = out[:, input_dim + 1:input_dim + 2]
    lv_b = out[:, input_dim + 2:input_dim + 3]
    lv_m = out[:, input_dim + 3:input_dim + 4]
    return recon, mu_b, lv_b, mu_m, lv_m


def init_linear(key, fan_in, fan_out):
    """PyTorch nn.Linear default init: U(-1/sqrt(fan_in), 1/sqrt(fan_in))."""
    kw, kb = jax.random.split(key)
    bound = 1.0 / jnp.sqrt(float(fan_in))
    w = jax.random.uniform(kw, (fan_in, fan_out), jnp.float32, -bound, bound)
    b = jax.random.uniform(kb, (1, fan_out), jnp.float32, -bound, bound)
    return w, b


def init_params(key, input_dim):
    keys = jax.random.split(key, 8)
    # beta branch: Linear(input_dim,64), Linear(64,32), mu head, log_var head
    w1b, b1b = init_linear(keys[0], input_dim, H1)
    w2b, b2b = init_linear(keys[1], H1, H2)
    wmub, bmub = init_linear(keys[2], H2, 1)
    wlvb, blvb = init_linear(keys[3], H2, 1)
    # mu branch
    w1m, b1m = init_linear(keys[4], input_dim, H1)
    w2m, b2m = init_linear(keys[5], H1, H2)
    wmum, bmum = init_linear(keys[6], H2, 1)
    wlvm, blvm = init_linear(keys[7], H2, 1)
    return (w1b, b1b, w2b, b2b, wmub, bmub, wlvb, blvb,
            w1m, b1m, w2m, b2m, wmum, bmum, wlvm, blvm)


def reference_forward(x, eps_beta, eps_mu, params):
    """Pure-JAX reference (unfused) for correctness checking."""
    (w1b, b1b, w2b, b2b, wmub, bmub, wlvb, blvb,
     w1m, b1m, w2m, b2m, wmum, bmum, wlvm, blvm) = params

    def branch(w1, b1, w2, b2, wmu, bmu, wlv, blv):
        h = jnp.maximum(x @ w1 + b1, 0.0)
        h = jnp.maximum(h @ w2 + b2, 0.0)
        return h @ wmu + bmu, h @ wlv + blv

    mu_b, lv_b = branch(w1b, b1b, w2b, b2b, wmub, bmub, wlvb, blvb)
    mu_m, lv_m = branch(w1m, b1m, w2m, b2m, wmum, bmum, wlvm, blvm)
    z_b = mu_b + eps_beta * jnp.exp(0.5 * lv_b)
    z_m = mu_m + eps_mu * jnp.exp(0.5 * lv_m)
    return z_b * x + z_m, mu_b, lv_b, mu_m, lv_m


if __name__ == "__main__":
    B = 8
    INPUT_DIM = 1    # matches `input_dim = 1` in the PyTorch script
    LATENT_DIM = 16  # constructor arg; unused by the forward pass (as in PyTorch)

    root = jax.random.PRNGKey(0)
    k_x, k_eps_b, k_eps_m, k_params = jax.random.split(root, 4)

    x = jax.random.normal(k_x, (B, INPUT_DIM), jnp.float32)
    # eps = 0.1 * torch.randn_like(std), sampled host-side for determinism
    eps_beta = 0.1 * jax.random.normal(k_eps_b, (B, 1), jnp.float32)
    eps_mu = 0.1 * jax.random.normal(k_eps_m, (B, 1), jnp.float32)

    params = init_params(k_params, INPUT_DIM)
    slab = pack_params(params)

    outs = jax.jit(vae_forward)(x, eps_beta, eps_mu, slab)
    outs = jax.block_until_ready(outs)

    refs = reference_forward(x, eps_beta, eps_mu, params)
    for o, r in zip(outs, refs):
        assert o.shape == r.shape, (o.shape, r.shape)
        assert jnp.allclose(o, r, atol=2e-5, rtol=1e-4), "mismatch vs reference"

    print("KERNEL_OK")
</pallas_src>

<mosaic_0001>
module attributes {stable_mosaic.version = 11 : i64} {
  func.func @vae_kernel(%arg0: memref<8x128xf32, #tpu.memory_space<vmem>>, %arg1: memref<200x128xf32, #tpu.memory_space<vmem>>, %arg2: memref<8x128xf32, #tpu.memory_space<vmem>>) attributes {dimension_semantics = [], scalar_prefetch = 0 : i64, scratch_operands = 0 : i64, tpu.core_type = #tpu.core_type<tc>} {
    %c0 = arith.constant 0 : index
    %c0_0 = arith.constant 0 : index
    %0 = vector.load %arg0[%c0, %c0_0] : memref<8x128xf32, #tpu.memory_space<vmem>>, vector<8x128xf32>
    %1 = vector.extract_strided_slice %0 {offsets = [0, 0], sizes = [8, 1], strides = [1, 1]} : vector<8x128xf32> to vector<8x1xf32>
    %2 = vector.extract_strided_slice %0 {offsets = [0, 1], sizes = [8, 2], strides = [1, 1]} : vector<8x128xf32> to vector<8x2xf32>
    %c0_1 = arith.constant 0 : index
    %c0_2 = arith.constant 0 : index
    %3 = vector.load %arg1[%c0_1, %c0_2] : memref<200x128xf32, #tpu.memory_space<vmem>>, vector<1x128xf32>
    %c1 = arith.constant 1 : index
    %c0_3 = arith.constant 0 : index
    %4 = vector.load %arg1[%c1, %c0_3] : memref<200x128xf32, #tpu.memory_space<vmem>>, vector<1x128xf32>
    %c2 = arith.constant 2 : index
    %c0_4 = arith.constant 0 : index
    %5 = vector.load %arg1[%c2, %c0_4] : memref<200x128xf32, #tpu.memory_space<vmem>>, vector<1x64xf32>
    %c3 = arith.constant 3 : index
    %c0_5 = arith.constant 0 : index
    %6 = vector.load %arg1[%c3, %c0_5] : memref<200x128xf32, #tpu.memory_space<vmem>>, vector<1x4xf32>
    %c4 = arith.constant 4 : index
    %c0_6 = arith.constant 0 : index
    %7 = vector.load %arg1[%c4, %c0_6] : memref<200x128xf32, #tpu.memory_space<vmem>>, vector<128x64xf32>
    %c132 = arith.constant 132 : index
    %c0_7 = arith.constant 0 : index
    %8 = vector.load %arg1[%c132, %c0_7] : memref<200x128xf32, #tpu.memory_space<vmem>>, vector<64x4xf32>
    %9 = vector.broadcast %1 : vector<8x1xf32> to vector<8x128xf32>
    %10 = vector.broadcast %3 : vector<1x128xf32> to vector<8x128xf32>
    %11 = arith.mulf %9, %10 : vector<8x128xf32>
    %12 = vector.broadcast %4 : vector<1x128xf32> to vector<8x128xf32>
    %13 = arith.addf %11, %12 : vector<8x128xf32>
    %cst = arith.constant 0.000000e+00 : f32
    %14 = vector.broadcast %cst : f32 to vector<8x128xf32>
    %15 = arith.maximumf %13, %14 : vector<8x128xf32>
    %cst_8 = arith.constant dense<0.000000e+00> : vector<8x64xf32>
    %16 = tpu.matmul %15, %7, %cst_8 {dimension_numbers = #tpu.dot_dimension_numbers<[1], [0], [0], [1], [0, 0, 1, 1], [], []>} : vector<8x128xf32>, vector<128x64xf32>, vector<8x64xf32> -> vector<8x64xf32>
    %17 = vector.broadcast %5 : vector<1x64xf32> to vector<8x64xf32>
    %18 = arith.addf %16, %17 : vector<8x64xf32>
    %cst_9 = arith.constant 0.000000e+00 : f32
    %19 = vector.broadcast %cst_9 : f32 to vector<8x64xf32>
    %20 = arith.maximumf %18, %19 : vector<8x64xf32>
    %cst_10 = arith.constant dense<0.000000e+00> : vector<8x4xf32>
    %21 = tpu.matmul %20, %8, %cst_10 {dimension_numbers = #tpu.dot_dimension_numbers<[1], [0], [0], [1], [0, 0, 1, 1], [], []>} : vector<8x64xf32>, vector<64x4xf32>, vector<8x4xf32> -> vector<8x4xf32>
    %22 = vector.broadcast %6 : vector<1x4xf32> to vector<8x4xf32>
    %23 = arith.addf %21, %22 : vector<8x4xf32>
    %24 = vector.extract_strided_slice %23 {offsets = [0, 0], sizes = [8, 2], strides = [1, 1]} : vector<8x4xf32> to vector<8x2xf32>
    %25 = vector.extract_strided_slice %23 {offsets = [0, 2], sizes = [8, 2], strides = [1, 1]} : vector<8x4xf32> to vector<8x2xf32>
    %cst_11 = arith.constant 5.000000e-01 : f32
    %26 = vector.broadcast %cst_11 : f32 to vector<8x2xf32>
    %27 = arith.mulf %26, %25 : vector<8x2xf32>
    %28 = math.exp %27 : vector<8x2xf32>
    %29 = arith.mulf %2, %28 : vector<8x2xf32>
    %30 = arith.addf %24, %29 : vector<8x2xf32>
    %31 = vector.extract_strided_slice %30 {offsets = [0, 0], sizes = [8, 1], strides = [1, 1]} : vector<8x2xf32> to vector<8x1xf32>
    %32 = arith.mulf %31, %1 : vector<8x1xf32>
    %33 = vector.extract_strided_slice %30 {offsets = [0, 1], sizes = [8, 1], strides = [1, 1]} : vector<8x2xf32> to vector<8x1xf32>
    %34 = arith.addf %32, %33 : vector<8x1xf32>
    %cst_12 = arith.constant 0.000000e+00 : f32
    %35 = vector.broadcast %cst_12 : f32 to vector<8x123xf32>
    %36 = tpu.concatenate %34, %23, %35 in 1 : vector<8x1xf32>, vector<8x4xf32>, vector<8x123xf32> -> vector<8x128xf32>
    %c0_13 = arith.constant 0 : index
    %c0_14 = arith.constant 0 : index
    %37 = vector.load %arg2[%c0_13, %c0_14] : memref<8x128xf32, #tpu.memory_space<vmem>>, vector<8x128xf32>
    tpu.vector_store %arg2[%c0_13, %c0_14], %36 {strides = array<i32>} : memref<8x128xf32, #tpu.memory_space<vmem>>, vector<8x128xf32>,
    return
  }
}

</mosaic_0001>

<bundles_post_ra>
// kernel: vae_forward.1
= control target key start
LH: loop header
LB: loop body
LE: loop exit
PB: predicated region body
PF: predicated region fallthrough
CT: control target
= control target key end

     0   :  { %7 = vsyncpa [#allocation3], 0  ;;  %s413_s9 = smov [#allocation2]   ;;  %s460_s0 = inlined_call_operand.vmem [shape: f32[8,128], index: 0, kind: input, shape index: {}]   ;;  %s461_s1 = inlined_call_operand.hbm [shape: f32[200,128], index: 1, kind: input, shape index: {}]   ;;  %s462_s2 = inlined_call_operand.vmem [shape: f32[8,128], index: 2, kind: output, shape index: {}]  }
   0x1   :  { %s15_s10 = sshll.u32 %s413_s9, 4  ;;  %s389_s13 = scalar_lea.hbm %s461_s1, 3200  ;;  %s16_s10 = int_to_ptr.vmem [resolvable:$true] %s15_s10 }
   0x2   :  { %p390_p0 = scmp.ne.s32.totalorder %s461_s1, %s389_s13  ;;  %p393_p1 = scmp.lt.u32.totalorder %s389_s13, %s461_s1 }
   0x4   :  { %p395_p2 = pnand %p393_p1, %p390_p0 }
   0x6   :  { %398 = shalt.err (!%p395_p2)
}
   0x7   :  { %s399_s18 = scalar_lea.vmem %s16_s10, 3200  ;;  %p404_p4 = scmp.lt.s32.totalorder %s16_s10, %s16_s10 }
   0x8   :  { %p400_p3 = scmp.ne.s32.totalorder %s16_s10, %s399_s18  ;;  %p405_p5 = scmp.lt.s32.totalorder %s399_s18, %s399_s18 }
   0xa   :  { %p406_p6 = por %p405_p5, %p404_p4 }
   0xc   :  { %p407_p7 = pnand %p406_p6, %p400_p3 }
   0xe   :  { %410 = shalt.err (!%p407_p7)
}
   0xf   :  { %s414_s19 = smov 128   ;;  %s415_s20 = smov 8  }
  0x10   :  { %21 = dma.hbm_to_vmem [thread:$0]  %s461_s1, 3200, %s16_s10, [#allocation3], %s414_s19, %s414_s19, %s415_s20  }
  0x11   :  { %411 = dma.done.wait [#allocation3], 3200  }
  0x12   :  { %412 = vsyncadd [#allocation3], 4294964096  ;;  %v416_v0 = vmov 0   ;;  %v417_v1 = vmov 0.0|0.0   ;;  %v452_v2 = vld [vmem:[%s460_s0] sm:$0xff]  ;;  %v31_v4 = vld [vmem:[#allocation2 + $0xc] sm:$0xff] }
  0x13   :  { %386 = vset.pattern.permute.xlu0 %v416_v0  ;;  %341 = vmatprep.subr.bf16.mxu0 %v417_v1  ;;  %v30_v3 = vld [vmem:[#allocation2 + $0x4] sm:$0xff]  ;;  %v32_v6 = vld [vmem:[#allocation2 + $0x14] sm:$0xff]  ;;  %v33_v7 = vld [vmem:[#allocation2 + $0x1c] sm:$0xff]  ;;  %vm418_vm0 = vmmov 0   ;;  %v419_v12 = vmov 0.0   ;;  %vm149_vm1 = vcmask 523264  }
  0x14   :  { %365 = vmatprep.subr.bf16.mxu1 %v417_v1  ;;  %56 = vperm.xlu0 %386, %v452_v2   ;;  %v342_v5 = vpack.c.bf16 %v31_v4, %v30_v3  ;;  %v345_v8 = vpack.c.bf16 %v33_v7, %v32_v6  ;;  %v34_v9 = vld [vmem:[#allocation2 + $0x24] sm:$0xff]  ;;  %v35_v10 = vld [vmem:[#allocation2 + $0x2c] sm:$0xff]  ;;  %v48_v15 = vld [vmem:[#allocation2 + $0x94] sm:$0xff]  ;;  %s420_s0 = smov 127   ;;  %s421_s1 = smov 1   ;;  %vm246_vm2 = vcmask 7168  }
  0x15   :  { %v348_v11 = vpack.c.bf16 %v35_v10, %v34_v9  ;;  %319 = vmatprep.mubr.msk.f32.mxu0 %vm418_vm0, %v419_v12  ;;  %v46_v13 = vld [vmem:[#allocation2 + $0x84] sm:$0xff]  ;;  %v47_v14 = vld [vmem:[#allocation2 + $0x8c] sm:$0xff]  ;;  %v36_v16 = vld [vmem:[#allocation2 + $0x34] sm:$0xff]  ;;  %338 = vmatprep.mubr.msk.f32.mxu1 %vm418_vm0, %v419_v12  ;;  %vm248_vm3 = vcmask 39936  }
  0x16   :  { %343 = vmatpush3.bf16.msra.mxu0 %v342_v5  ;;  %v37_v17 = vld [vmem:[#allocation2 + $0x3c] sm:$0xff]  ;;  %v366_v18 = vpack.c.bf16 %v47_v14, %v46_v13  ;;  %v50_v22 = vld [vmem:[#allocation2 + $0xa4] sm:$0xff]  ;;  %v51_v23 = vld [vmem:[#allocation2 + $0xac] sm:$0xff] }
  0x17   :  { %344 = vmatprep.subr.bf16.mxu0 %v417_v1  ;;  %v49_v19 = vld [vmem:[#allocation2 + $0x9c] sm:$0xff]  ;;  %v351_v21 = vpack.c.bf16 %v37_v17, %v36_v16  ;;  %v38_v24 = vld [vmem:[#allocation2 + $0x44] sm:$0xff]  ;;  %v39_v25 = vld [vmem:[#allocation2 + $0x4c] sm:$0xff]  ;;  %v372_v26 = vpack.c.bf16 %v51_v23, %v50_v22 }
  0x18   :  { %367 = vmatpush3.bf16.msra.mxu1 %v366_v18  ;;  %v369_v20 = vpack.c.bf16 %v49_v19, %v48_v15  ;;  %v354_v27 = vpack.c.bf16 %v39_v25, %v38_v24  ;;  %v40_v28 = vld [vmem:[#allocation2 + $0x54] sm:$0xff]  ;;  %v41_v29 = vld [vmem:[#allocation2 + $0x5c] sm:$0xff]  ;;  %v42_v31 = vld [vmem:[#allocation2 + $0x64] sm:$0xff] }
  0x19   :  { %368 = vmatprep.subr.bf16.mxu1 %v417_v1  ;;  %v357_v30 = vpack.c.bf16 %v41_v29, %v40_v28  ;;  %v43_v32 = vld [vmem:[#allocation2 + $0x6c] sm:$0xff]  ;;  %v44_v34 = vld [vmem:[#allocation2 + $0x74] sm:$0xff]  ;;  %v45_v35 = vld [vmem:[#allocation2 + $0x7c] sm:$0xff] }
  0x1a   :  { %346 = vmatpush3.bf16.msra.mxu0 %v345_v8  ;;  %v360_v33 = vpack.c.bf16 %v43_v32, %v42_v31  ;;  %v363_v36 = vpack.c.bf16 %v45_v35, %v44_v34  ;;  %v256_v37 = vld [vmem:[#allocation2] ss:$0 sm:$0xff]  ;;  %v257_v38 = vld [vmem:[#allocation2 + $0x1] ss:$0 sm:$0xff]  ;;  %v52_v43 = vld [vmem:[#allocation2 + $0xb4] sm:$0xff] }
  0x1b   :  { %347 = vmatprep.subr.bf16.mxu0 %v417_v1  ;;  %v53_v44 = vld [vmem:[#allocation2 + $0xbc] sm:$0xff] }
  0x1c   :  { %370 = vmatpush3.bf16.msra.mxu1 %v369_v20  ;;  %v375_v45 = vpack.c.bf16 %v53_v44, %v52_v43  ;;  %v258_v46 = vld [vmem:[#allocation2 + $0x2] ss:$0 sm:$0xff]  ;;  %v259_v51 = vld [vmem:[#allocation2 + $0x3] ss:$0 sm:$0xff] }
  0x1d   :  { %371 = vmatprep.subr.bf16.mxu1 %v417_v1 }
  0x1e   :  { %349 = vmatpush3.bf16.msra.mxu0 %v348_v11 }
  0x1f   :  { %350 = vmatprep.subr.bf16.mxu0 %v417_v1 }
  0x20   :  { %373 = vmatpush3.bf16.msra.mxu1 %v372_v26 }
  0x21   :  { %374 = vmatprep.subr.bf16.mxu1 %v417_v1 }
  0x22   :  { %352 = vmatpush3.bf16.msra.mxu0 %v351_v21 }
  0x23   :  { %353 = vmatprep.subr.bf16.mxu0 %v417_v1 }
  0x24   :  { %376 = vmatpush3.bf16.msra.mxu1 %v375_v45 }
  0x26   :  { %355 = vmatpush3.bf16.msra.mxu0 %v354_v27 }
  0x27   :  { %356 = vmatprep.subr.bf16.mxu0 %v417_v1 }
  0x2a   :  { %358 = vmatpush3.bf16.msra.mxu0 %v357_v30 }
  0x2b   :  { %359 = vmatprep.subr.bf16.mxu0 %v417_v1 }
  0x2e   :  { %361 = vmatpush3.bf16.msra.mxu0 %v360_v33 }
  0x2f   :  { %362 = vmatprep.subr.bf16.mxu0 %v417_v1 }
  0x32   :  { %364 = vmatpush3.bf16.msra.mxu0 %v363_v36 }
  0x93   :  { %v57_v39 = vpop.permute.xlu0 %56 }
  0x94   :  { %v63_v40 = vmul.f32 %v256_v37, %v57_v39 }
  0x96   :  { %v68_v41 = vadd.f32 %v257_v38, %v63_v40 }
  0x98   :  { %v69_v42 = vmax.f32 %v68_v41, 0.0 }
  0x9a   :  { %320 = vmatmul.mubr.f32.vlgmr.msra.gmra.mrb[0].mxu0 %v69_v42 }
 0x16d   :  { %v140_v47 = vpop.f32.mrb[0].mxu0 }
 0x16e   :  { %v141_v48 = vadd.f32 %v258_v46, %v140_v47  ;;  %v321_v49 = vpop.f32.mrb[1].mxu0 }
 0x170   :  { %v144_v50 = vmax.f32 %v141_v48, 0.0 }
 0x172   :  { %339 = vmatmul.mubr.msk.f32.vlgmr.msra.gmra.mrb[0].mxu1 %vm149_vm1, %v144_v50 }
 0x245   :  { %v219_v52 = vpop.f32.mrb[0].mxu1 }
 0x246   :  { %v220_v53 = vadd.f32 %v259_v51, %v219_v52  ;;  %v340_v54 = vpop.f32.mrb[1].mxu1 }
 0x248   :  { %v223_v55 = vmul.f32 0.5, %v220_v53 }
 0x24a   :  { %v224_v56 = vmul.f32 1.442695, %v223_v55 }
 0x24c   :  { %387 = vpow2.f32 %v224_v56 }
 0x256   :  { %v388_v57 = vpop.eup %387 }
 0x257   :  { %227 = vrot.lane.b32.xlu0 %v388_v57, %s420_s0 }
 0x25b   :  { %243 = vrot.lane.b32.xlu0 %v220_v53, %s421_s1 }
 0x2c9   :  { %v228_v58 = vpop.permute.xlu0 %227 }
 0x2ca   :  { %v230_v59 = vmul.f32 %v228_v58, %v452_v2 }
 0x2cc   :  { %232 = vrot.lane.b32.xlu1 %v230_v59, %s420_s0 }
 0x2cd   :  { %v244_v1 = vpop.permute.xlu0 %243 }
 0x33e   :  { %v233_v60 = vpop.permute.xlu1 %232 }
 0x33f   :  { %v235_v61 = vadd.f32 %v233_v60, %v220_v53 }
 0x341   :  { %238 = vrot.lane.b32.xlu1 %v235_v61, %s420_s0  ;;  %v236_v62 = vmul.f32 %v235_v61, %v452_v2 }
 0x3b3   :  { %v239_v63 = vpop.permute.xlu1 %238 }
 0x3b4   :  { %v241_v0 = vadd.f32 %v239_v63, %v236_v62 }
 0x3b6   :  { %v247_v3 = vsel %vm246_vm2, %v241_v0, %v244_v1 }
 0x3b7   :  { %v249_v4 = vsel %vm248_vm3, %v247_v3, 0.0 }
 0x3b8   :  { %250 = vst [vmem:[%s462_s2] sm:$0xff] %v249_v4 }
 0x3b9   :  { %255 = vsyncpa [#allocation3], 1 }

</bundles_post_ra>
